<compile_context>
chip_gen: v7x
topology: tpu7x:2x2x1
jax: 0.10.0
libtpu: 0.0.40
codegen_flags: <defaults>
</compile_context>

<pallas_src>
import functools

import jax
import jax.numpy as jnp
from jax import lax
from jax.experimental import pallas as pl
from jax.experimental.pallas import tpu as pltpu

LANES = 128
SUBLANES = 8
MAX_TILE_ROWS = 2048  # 2048 x 128 x f32 = 1 MiB per input per pipeline buffer.


def _focal_elementwise(x, t, alpha, gamma):
    """Per-element focal loss, matching the PyTorch module's forward (f32 math)."""
    x = x.astype(jnp.float32)
    t = t.astype(jnp.float32)
    # Numerically-stable BCE with logits (== F.binary_cross_entropy_with_logits):
    #   bce = max(x, 0) - x*t + log(1 + exp(-|x|))
    bce = jnp.maximum(x, 0.0) - x * t + jnp.log1p(jnp.exp(-jnp.abs(x)))
    pt = jnp.exp(-bce)
    one_minus_pt = 1.0 - pt
    g_int = int(gamma)
    if float(g_int) == float(gamma) and 0 <= g_int <= 8:
        # Integer gamma (default 2.0): repeated multiplies, no exp/log pair.
        if g_int == 0:
            mod = jnp.ones_like(one_minus_pt)
        else:
            mod = one_minus_pt
            for _ in range(g_int - 1):
                mod = mod * one_minus_pt
    else:
        mod = jnp.power(one_minus_pt, jnp.float32(gamma))
    return alpha * mod * bce


def _focal_sum_kernel(x_ref, t_ref, out_ref, acc_ref, *,
                      alpha, gamma, steps_per_chunk, tile_rows, n_valid):
    """Grid = (chunk, step): accumulate this chunk's focal-loss partial sums.

    acc_ref is a single-vreg (8, 128) accumulator; each step does a layout-free
    reshape + cross-vreg sum of the (tile_rows, 128) tile before accumulating.
    """
    c = pl.program_id(0)
    i = pl.program_id(1)

    @pl.when(i == 0)
    def _():
        acc_ref[...] = jnp.zeros_like(acc_ref)

    f_loss = _focal_elementwise(x_ref[...], t_ref[...], alpha, gamma)

    tile_elems = tile_rows * LANES
    base = (c * steps_per_chunk + i) * tile_elems
    tile_full = base + tile_elems <= n_valid

    # Steady state: no mask at all (pure VPU/EUP + DMA).
    @pl.when(tile_full)
    def _():
        acc_ref[...] += f_loss.reshape(
            tile_rows // SUBLANES, SUBLANES, LANES).sum(axis=0)

    # Only the tile that straddles (or lies past) the valid region builds a mask;
    # garbage rows beyond the array edge (partial-block DMA) are zeroed by the mask.
    @pl.when(jnp.logical_not(tile_full))
    def _():
        row = lax.broadcasted_iota(jnp.int32, (tile_rows, LANES), 0)
        lane = lax.broadcasted_iota(jnp.int32, (tile_rows, LANES), 1)
        idx = base + row * LANES + lane
        contrib = jnp.where(idx < n_valid, f_loss, 0.0)
        acc_ref[...] += contrib.reshape(
            tile_rows // SUBLANES, SUBLANES, LANES).sum(axis=0)

    # Last step of this chunk: just store the vreg accumulator; the 4 KiB final
    # reduction over (num_chunks, 8, 128) happens in the wrapper (XLA).
    @pl.when(i == pl.num_programs(1) - 1)
    def _():
        out_ref[...] = acc_ref[...].reshape(out_ref.shape)


def _focal_none_kernel(x_ref, t_ref, o_ref, *, alpha, gamma):
    o_ref[...] = _focal_elementwise(x_ref[...], t_ref[...], alpha, gamma).astype(o_ref.dtype)


def focal_loss(inputs, targets, alpha=0.25, gamma=2.0, reduction="mean"):
    """Pallas TPU focal loss. inputs/targets: same shape, any rank."""
    assert inputs.shape == targets.shape
    n_elems = inputs.size
    assert n_elems > 0
    # In-kernel index math is int32.
    assert n_elems < 2**31 - 2 * MAX_TILE_ROWS * LANES

    x_flat = inputs.reshape(-1)   # free (row-major bitcast)
    t_flat = targets.reshape(-1)

    # Lane-aligned bulk goes through the kernel; the ragged remainder (<128 elems,
    # or everything for sub-8-row inputs) is handled by a negligible pure-JAX path.
    n_bulk = (n_elems // LANES) * LANES
    rows = n_bulk // LANES
    if rows < SUBLANES:
        n_bulk, rows = 0, 0
    n_tail = n_elems - n_bulk

    tail = None
    if n_tail:
        tail = _focal_elementwise(x_flat[n_bulk:], t_flat[n_bulk:], alpha, gamma)

    x2 = t2 = None
    tile_rows = total_blocks = 0
    if rows:
        if n_bulk == n_elems:
            # Zero-copy lane-dense view (the common case, incl. all test shapes).
            x2 = x_flat.reshape(rows, LANES)
            t2 = t_flat.reshape(rows, LANES)
        else:
            # TODO(synk): the prefix slice still copies the bulk once when
            # n_elems % 128 != 0; a 1-D-block kernel over the raw flat array would avoid it.
            x2 = x_flat[:n_bulk].reshape(rows, LANES)
            t2 = t_flat[:n_bulk].reshape(rows, LANES)
        tile_rows = min(MAX_TILE_ROWS, (rows // SUBLANES) * SUBLANES)
        total_blocks = pl.cdiv(rows, tile_rows)

    if reduction in ("mean", "sum"):
        total = jnp.zeros((), jnp.float32)
        if rows:
            # Two independent chunks (one per TensorCore on multi-core parts) when
            # there is enough work; partials are summed in the wrapper.
            # TODO(synk): switch the chunk axis to pltpu.CORE_PARALLEL on v7x once
            # per-device core-count detection is available.
            num_chunks = 2 if total_blocks >= 2 else 1
            spc = pl.cdiv(total_blocks, num_chunks)
            last_block = total_blocks - 1

            kernel = functools.partial(
                _focal_sum_kernel, alpha=float(alpha), gamma=float(gamma),
                steps_per_chunk=spc, tile_rows=tile_rows, n_valid=n_bulk)

            # Clamp the block index so overflow steps (odd block counts) re-read an
            # in-bounds tile; their contribution is fully masked in-kernel.
            in_spec = pl.BlockSpec(
                (tile_rows, LANES),
                lambda c, i, spc=spc, last=last_block: (jnp.minimum(c * spc + i, last), 0))

            out = pl.pallas_call(
                kernel,
                out_shape=jax.ShapeDtypeStruct((num_chunks, SUBLANES, LANES), jnp.float32),
                grid_spec=pltpu.PrefetchScalarGridSpec(
                    num_scalar_prefetch=0,
                    grid=(num_chunks, spc),
                    in_specs=[in_spec, in_spec],
                    out_specs=pl.BlockSpec((1, SUBLANES, LANES), lambda c, i: (c, 0, 0)),
                    scratch_shapes=[pltpu.VMEM((SUBLANES, LANES), jnp.float32)]),
                compiler_params=pltpu.CompilerParams(
                    dimension_semantics=("parallel", "arbitrary"),
                    vmem_limit_bytes=32 * 1024 * 1024),
            )(x2, t2)
            total = jnp.sum(out)
        if n_tail:
            total = total + jnp.sum(tail.astype(jnp.float32))
        if reduction == "mean":
            return total / jnp.float32(n_elems)
        return total

    # reduction == 'none': per-element losses, written directly in the input dtype.
    out_dtype = inputs.dtype
    pieces = []
    if rows:
        kernel = functools.partial(
            _focal_none_kernel, alpha=float(alpha), gamma=float(gamma))
        spec = pl.BlockSpec((tile_rows, LANES), lambda i: (i, 0))
        out2 = pl.pallas_call(
            kernel,
            out_shape=jax.ShapeDtypeStruct((rows, LANES), out_dtype),
            grid_spec=pltpu.PrefetchScalarGridSpec(
                num_scalar_prefetch=0,
                grid=(total_blocks,),
                in_specs=[spec, spec],
                out_specs=spec),
            compiler_params=pltpu.CompilerParams(
                dimension_semantics=("parallel",),
                vmem_limit_bytes=32 * 1024 * 1024),
        )(x2, t2)
        pieces.append(out2.reshape(-1))
    if n_tail:
        pieces.append(tail.astype(out_dtype))
    flat = pieces[0] if len(pieces) == 1 else jnp.concatenate(pieces)
    return flat.reshape(inputs.shape)


def _focal_loss_ref(inputs, targets, alpha=0.25, gamma=2.0, reduction="mean"):
    x = inputs.astype(jnp.float32)
    t = targets.astype(jnp.float32)
    bce = jnp.maximum(x, 0.0) - x * t + jnp.log1p(jnp.exp(-jnp.abs(x)))
    pt = jnp.exp(-bce)
    fl = alpha * (1.0 - pt) ** gamma * bce
    if reduction == "mean":
        return jnp.mean(fl)
    if reduction == "sum":
        return jnp.sum(fl)
    return fl


if __name__ == "__main__":
    key = jax.random.PRNGKey(0)
    k1, k2, k3, k4, k5, k6 = jax.random.split(key, 6)

    # Small NCHW-like shape consistent with a detection-style focal loss.
    shape = (2, 4, 16, 16)
    logits = jax.random.normal(k1, shape, dtype=jnp.float32)
    targets = (jax.random.uniform(k2, shape) > 0.5).astype(jnp.float32)

    out_mean = jax.block_until_ready(focal_loss(logits, targets, reduction="mean"))
    ref_mean = _focal_loss_ref(logits, targets, reduction="mean")
    assert jnp.allclose(out_mean, ref_mean, rtol=1e-5, atol=1e-6), (out_mean, ref_mean)

    out_none = jax.block_until_ready(focal_loss(logits, targets, reduction="none"))
    ref_none = _focal_loss_ref(logits, targets, reduction="none")
    assert jnp.allclose(out_none, ref_none, rtol=1e-5, atol=1e-6)

    # Larger shape: multi-tile pipelining, the partial-final-block mask path, and the
    # 2-way chunk split (element count is 128-aligned, so zero-copy slab view).
    shape2 = (2, 8, 128, 130)
    logits2 = jax.random.normal(k3, shape2, dtype=jnp.float32)
    targets2 = (jax.random.uniform(k4, shape2) > 0.5).astype(jnp.float32)
    out_sum = jax.block_until_ready(focal_loss(logits2, targets2, reduction="sum"))
    ref_sum = _focal_loss_ref(logits2, targets2, reduction="sum")
    assert jnp.allclose(out_sum, ref_sum, rtol=1e-4, atol=1e-2), (out_sum, ref_sum)

    # Ragged element count (not a multiple of 128): exercises the bulk-kernel + tiny
    # pure-JAX lane-tail combination for both reductions.
    shape3 = (5, 1000)
    logits3 = jax.random.normal(k5, shape3, dtype=jnp.float32)
    targets3 = (jax.random.uniform(k6, shape3) > 0.5).astype(jnp.float32)
    out_sum3 = jax.block_until_ready(focal_loss(logits3, targets3, reduction="sum"))
    ref_sum3 = _focal_loss_ref(logits3, targets3, reduction="sum")
    assert jnp.allclose(out_sum3, ref_sum3, rtol=1e-5, atol=1e-3), (out_sum3, ref_sum3)
    out_none3 = jax.block_until_ready(focal_loss(logits3, targets3, reduction="none"))
    ref_none3 = _focal_loss_ref(logits3, targets3, reduction="none")
    assert jnp.allclose(out_none3, ref_none3, rtol=1e-5, atol=1e-6)

    print("KERNEL_OK")
</pallas_src>

<mosaic_0001>
module attributes {stable_mosaic.version = 11 : i64} {
  func.func @_focal_sum_kernel(%arg0: i32, %arg1: i32, %arg2: memref<16x128xf32, #tpu.memory_space<vmem>>, %arg3: memref<16x128xf32, #tpu.memory_space<vmem>>, %arg4: memref<1x8x128xf32, #tpu.memory_space<vmem>>, %arg5: memref<8x128xf32, #tpu.memory_space<vmem>>) attributes {dimension_semantics = [#tpu.dimension_semantics<parallel>, #tpu.dimension_semantics<arbitrary>], iteration_bounds = array<i64: 1, 1>, scalar_prefetch = 0 : i64, scratch_operands = 1 : i64, tpu.core_type = #tpu.core_type<tc>, window_params = [{transform_indices = @transform_0, window_bounds = array<i64: 16, 128>}, {transform_indices = @transform_1, window_bounds = array<i64: 16, 128>}, {transform_indices = @transform_2, window_bounds = array<i64: 1, 8, 128>}]} {
    %c0_i32 = arith.constant 0 : i32
    %0 = arith.cmpi eq, %arg1, %c0_i32 : i32
    %1 = arith.extui %0 : i1 to i32
    %c0_i32_0 = arith.constant 0 : i32
    %2 = arith.cmpi ne, %1, %c0_i32_0 : i32
    scf.if %2 {
      %cst_14 = arith.constant 0.000000e+00 : f32
      %37 = vector.broadcast %cst_14 : f32 to vector<8x128xf32>
      %c0_15 = arith.constant 0 : index
      %c0_16 = arith.constant 0 : index
      %38 = vector.load %arg5[%c0_15, %c0_16] : memref<8x128xf32, #tpu.memory_space<vmem>>, vector<8x128xf32>
      tpu.vector_store %arg5[%c0_15, %c0_16], %37 {strides = array<i32>} : memref<8x128xf32, #tpu.memory_space<vmem>>, vector<8x128xf32>,
    } else {
    }
    %c0 = arith.constant 0 : index
    %c0_1 = arith.constant 0 : index
    %3 = vector.load %arg2[%c0, %c0_1] : memref<16x128xf32, #tpu.memory_space<vmem>>, vector<16x128xf32>
    %c0_2 = arith.constant 0 : index
    %c0_3 = arith.constant 0 : index
    %4 = vector.load %arg3[%c0_2, %c0_3] : memref<16x128xf32, #tpu.memory_space<vmem>>, vector<16x128xf32>
    %cst = arith.constant 0.000000e+00 : f32
    %5 = vector.broadcast %cst : f32 to vector<16x128xf32>
    %6 = arith.maximumf %3, %5 : vector<16x128xf32>
    %7 = arith.mulf %3, %4 : vector<16x128xf32>
    %8 = arith.subf %6, %7 : vector<16x128xf32>
    %9 = math.absf %3 : vector<16x128xf32>
    %cst_4 = arith.constant 0.000000e+00 : f32
    %10 = vector.broadcast %cst_4 : f32 to vector<16x128xf32>
    %11 = arith.subf %10, %9 : vector<16x128xf32>
    %12 = math.exp %11 : vector<16x128xf32>
    %13 = math.log1p %12 : vector<16x128xf32>
    %14 = arith.addf %8, %13 : vector<16x128xf32>
    %cst_5 = arith.constant 0.000000e+00 : f32
    %15 = vector.broadcast %cst_5 : f32 to vector<16x128xf32>
    %16 = arith.subf %15, %14 : vector<16x128xf32>
    %17 = math.exp %16 : vector<16x128xf32>
    %cst_6 = arith.constant 1.000000e+00 : f32
    %18 = vector.broadcast %cst_6 : f32 to vector<16x128xf32>
    %19 = arith.subf %18, %17 : vector<16x128xf32>
    %20 = arith.mulf %19, %19 : vector<16x128xf32>
    %cst_7 = arith.constant 2.500000e-01 : f32
    %21 = vector.broadcast %cst_7 : f32 to vector<16x128xf32>
    %22 = arith.mulf %21, %20 : vector<16x128xf32>
    %23 = arith.mulf %22, %14 : vector<16x128xf32>
    %c1_i32 = arith.constant 1 : i32
    %24 = arith.muli %arg0, %c1_i32 : i32
    %25 = arith.addi %24, %arg1 : i32
    %c2048_i32 = arith.constant 2048 : i32
    %26 = arith.muli %25, %c2048_i32 : i32
    %c2048_i32_8 = arith.constant 2048 : i32
    %27 = arith.addi %26, %c2048_i32_8 : i32
    %c2048_i32_9 = arith.constant 2048 : i32
    %28 = arith.cmpi sle, %27, %c2048_i32_9 : i32
    %29 = arith.extui %28 : i1 to i32
    %c0_i32_10 = arith.constant 0 : i32
    %30 = arith.cmpi ne, %29, %c0_i32_10 : i32
    scf.if %30 {
      %c0_14 = arith.constant 0 : index
      %c0_15 = arith.constant 0 : index
      %37 = vector.load %arg5[%c0_14, %c0_15] : memref<8x128xf32, #tpu.memory_space<vmem>>, vector<8x128xf32>
      %38 = vector.shape_cast %23 : vector<16x128xf32> to vector<2x8x128xf32>
      %cst_16 = arith.constant dense<0.000000e+00> : vector<8x128xf32>
      %39 = vector.multi_reduction <add>, %38, %cst_16 [0] : vector<2x8x128xf32> to vector<8x128xf32>
      %40 = arith.addf %37, %39 : vector<8x128xf32>
      %c0_17 = arith.constant 0 : index
      %c0_18 = arith.constant 0 : index
      %41 = vector.load %arg5[%c0_17, %c0_18] : memref<8x128xf32, #tpu.memory_space<vmem>>, vector<8x128xf32>
      tpu.vector_store %arg5[%c0_17, %c0_18], %40 {strides = array<i32>} : memref<8x128xf32, #tpu.memory_space<vmem>>, vector<8x128xf32>,
    } else {
    }
    %true = arith.constant true
    %31 = arith.xori %28, %true : i1
    %32 = arith.extui %31 : i1 to i32
    %c0_i32_11 = arith.constant 0 : i32
    %33 = arith.cmpi ne, %32, %c0_i32_11 : i32
    scf.if %33 {
      %37 = tpu.iota {dimensions = array<i32: 0>} : vector<16x128xi32>
      %38 = tpu.iota {dimensions = array<i32: 1>} : vector<16x128xi32>
      %c128_i32 = arith.constant 128 : i32
      %39 = vector.broadcast %c128_i32 : i32 to vector<16x128xi32>
      %40 = arith.muli %37, %39 : vector<16x128xi32>
      %41 = vector.broadcast %26 : i32 to vector<16x128xi32>
      %42 = arith.addi %41, %40 : vector<16x128xi32>
      %43 = arith.addi %42, %38 : vector<16x128xi32>
      %c2048_i32_14 = arith.constant 2048 : i32
      %44 = vector.broadcast %c2048_i32_14 : i32 to vector<16x128xi32>
      %45 = arith.cmpi slt, %43, %44 : vector<16x128xi32>
      %cst_15 = arith.constant 0.000000e+00 : f32
      %46 = vector.broadcast %cst_15 : f32 to vector<16x128xf32>
      %47 = arith.select %45, %23, %46 : vector<16x128xi1>, vector<16x128xf32>
      %c0_16 = arith.constant 0 : index
      %c0_17 = arith.constant 0 : index
      %48 = vector.load %arg5[%c0_16, %c0_17] : memref<8x128xf32, #tpu.memory_space<vmem>>, vector<8x128xf32>
      %49 = vector.shape_cast %47 : vector<16x128xf32> to vector<2x8x128xf32>
      %cst_18 = arith.constant dense<0.000000e+00> : vector<8x128xf32>
      %50 = vector.multi_reduction <add>, %49, %cst_18 [0] : vector<2x8x128xf32> to vector<8x128xf32>
      %51 = arith.addf %48, %50 : vector<8x128xf32>
      %c0_19 = arith.constant 0 : index
      %c0_20 = arith.constant 0 : index
      %52 = vector.load %arg5[%c0_19, %c0_20] : memref<8x128xf32, #tpu.memory_space<vmem>>, vector<8x128xf32>
      tpu.vector_store %arg5[%c0_19, %c0_20], %51 {strides = array<i32>} : memref<8x128xf32, #tpu.memory_space<vmem>>, vector<8x128xf32>,
    } else {
    }
    %c0_i32_12 = arith.constant 0 : i32
    %34 = arith.cmpi eq, %arg1, %c0_i32_12 : i32
    %35 = arith.extui %34 : i1 to i32
    %c0_i32_13 = arith.constant 0 : i32
    %36 = arith.cmpi ne, %35, %c0_i32_13 : i32
    scf.if %36 {
      %c0_14 = arith.constant 0 : index
      %c0_15 = arith.constant 0 : index
      %37 = vector.load %arg5[%c0_14, %c0_15] : memref<8x128xf32, #tpu.memory_space<vmem>>, vector<8x128xf32>
      %38 = vector.shape_cast %37 : vector<8x128xf32> to vector<1x8x128xf32>
      %c0_16 = arith.constant 0 : index
      %c0_17 = arith.constant 0 : index
      %c0_18 = arith.constant 0 : index
      %39 = vector.load %arg4[%c0_16, %c0_17, %c0_18] : memref<1x8x128xf32, #tpu.memory_space<vmem>>, vector<1x8x128xf32>
      tpu.vector_store %arg4[%c0_16, %c0_17, %c0_18], %38 {strides = array<i32>} : memref<1x8x128xf32, #tpu.memory_space<vmem>>, vector<1x8x128xf32>,
    } else {
    }
    return
  }
  func.func @transform_0(%arg0: i32, %arg1: i32) -> (i32, i32) {
    %c1_i32 = arith.constant 1 : i32
    %0 = arith.muli %arg0, %c1_i32 : i32
    %1 = arith.addi %0, %arg1 : i32
    %c0_i32 = arith.constant 0 : i32
    %2 = arith.minsi %1, %c0_i32 : i32
    %c0_i32_0 = arith.constant 0 : i32
    %c0_i32_1 = arith.constant 0 : i32
    return %2, %c0_i32_0 : i32, i32
  }
  func.func @transform_1(%arg0: i32, %arg1: i32) -> (i32, i32) {
    %c1_i32 = arith.constant 1 : i32
    %0 = arith.muli %arg0, %c1_i32 : i32
    %1 = arith.addi %0, %arg1 : i32
    %c0_i32 = arith.constant 0 : i32
    %2 = arith.minsi %1, %c0_i32 : i32
    %c0_i32_0 = arith.constant 0 : i32
    %c0_i32_1 = arith.constant 0 : i32
    return %2, %c0_i32_0 : i32, i32
  }
  func.func @transform_2(%arg0: i32, %arg1: i32) -> (i32, i32, i32) {
    %c0_i32 = arith.constant 0 : i32
    %c0_i32_0 = arith.constant 0 : i32
    %c0_i32_1 = arith.constant 0 : i32
    return %arg0, %c0_i32, %c0_i32_0 : i32, i32, i32
  }
}

</mosaic_0001>

<bundles_post_ra>
// kernel: tpu_custom_call.1
= control target key start
LH: loop header
LB: loop body
LE: loop exit
PB: predicated region body
PF: predicated region fallthrough
CT: control target
= control target key end

     0   :  { %7 = vsyncpa [#allocation4], 0  ;;  %s322_s0 = inlined_call_operand.hbm [shape: f32[16,128], index: 0, kind: input, shape index: {}]   ;;  %s323_s1 = inlined_call_operand.hbm [shape: f32[16,128], index: 1, kind: input, shape index: {}]   ;;  %s324_s2 = inlined_call_operand.hbm [shape: f32[1,8,128], index: 2, kind: output, shape index: {}]  }
   0x1   :  { %8 = vsyncpa [#allocation7], 0 }
   0x2   :  { %9 = vsyncpa [#allocation5], 0  ;;  %s266_s9 = smov [#allocation3]   ;;  %s194_s13 = scalar_lea.hbm %s322_s0, 256 }
   0x3   :  { %s21_s10 = sshll.u32 %s266_s9, 4  ;;  %p195_p0 = scmp.ne.s32.totalorder %s322_s0, %s194_s13  ;;  %s22_s10 = int_to_ptr.vmem [resolvable:$true] %s21_s10 }
   0x4   :  { %p198_p1 = scmp.lt.u32.totalorder %s194_s13, %s322_s0 }
   0x6   :  { %p200_p2 = pnand %p198_p1, %p195_p0 }
   0x8   :  { %203 = shalt.err (!%p200_p2)
}
   0x9   :  { %s204_s18 = scalar_lea.vmem %s22_s10, 256  ;;  %p209_p4 = scmp.lt.s32.totalorder %s22_s10, %s22_s10 }
   0xa   :  { %p205_p3 = scmp.ne.s32.totalorder %s22_s10, %s204_s18  ;;  %p210_p5 = scmp.lt.s32.totalorder %s204_s18, %s204_s18 }
   0xc   :  { %p211_p6 = por %p210_p5, %p209_p4 }
   0xe   :  { %p212_p7 = pnand %p211_p6, %p205_p3 }
  0x10   :  { %215 = shalt.err (!%p212_p7)
}
  0x11   :  { %s267_s19 = smov 128   ;;  %s268_s20 = smov 8  }
  0x12   :  { %27 = dma.hbm_to_vmem [thread:$0]  %s322_s0, 256, %s22_s10, [#allocation4], %s267_s19, %s267_s19, %s268_s20  }
  0x13   :  { %s269_s23 = smov [#allocation6]   ;;  %s216_s27 = scalar_lea.hbm %s323_s1, 256 }
  0x14   :  { %s39_s24 = sshll.u32 %s269_s23, 4  ;;  %p217_p8 = scmp.ne.s32.totalorder %s323_s1, %s216_s27  ;;  %s40_s24 = int_to_ptr.vmem [resolvable:$true] %s39_s24 }
  0x15   :  { %p220_p9 = scmp.lt.u32.totalorder %s216_s27, %s323_s1 }
  0x17   :  { %p222_p10 = pnand %p220_p9, %p217_p8 }
  0x19   :  { %225 = shalt.err (!%p222_p10)
}
  0x1a   :  { %s226_s4 = scalar_lea.vmem %s40_s24, 256  ;;  %p231_p12 = scmp.lt.s32.totalorder %s40_s24, %s40_s24 }
  0x1b   :  { %p227_p11 = scmp.ne.s32.totalorder %s40_s24, %s226_s4  ;;  %p232_p13 = scmp.lt.s32.totalorder %s226_s4, %s226_s4 }
  0x1d   :  { %p233_p0 = por %p232_p13, %p231_p12 }
  0x1f   :  { %p234_p1 = pnand %p233_p0, %p227_p11 }
  0x21   :  { %237 = shalt.err (!%p234_p1)
}
  0x22   :  { %45 = dma.hbm_to_vmem [thread:$0]  %s323_s1, 256, %s40_s24, [#allocation7], %s267_s19, %s267_s19, %s268_s20  }
  0x23   :  { %260 = dma.done.wait [#allocation4], 256  }
  0x24   :  { %261 = vsyncadd [#allocation4], 4294967040 }
  0x25   :  { %262 = dma.done.wait [#allocation7], 256  }
  0x26   :  { %263 = vsyncadd [#allocation7], 4294967040  ;;  %v65_v0 = vld [vmem:[#allocation3] sm:$0xff]  ;;  %v66_v1 = vld [vmem:[#allocation3 + $0x8] sm:$0xff]  ;;  %s270_s1 = smov [#allocation8]  }
  0x27   :  { %v75_v2 = vand.u32 2147483647, %v65_v0  ;;  %v76_v3 = vand.u32 2147483647, %v66_v1  ;;  %v67_v14 = vld [vmem:[#allocation6] sm:$0xff]  ;;  %v68_v15 = vld [vmem:[#allocation6 + $0x8] sm:$0xff] }
  0x28   :  { %v69_v17 = vmax.f32 %v65_v0, 0.0  ;;  %v71_v18 = vmul.f32 %v67_v14, %v65_v0  ;;  %v70_v21 = vmax.f32 %v66_v1, 0.0  ;;  %v72_v22 = vmul.f32 %v68_v15, %v66_v1  ;;  %s163_s6 = sshll.u32 %s270_s1, 4  ;;  %s164_s6 = int_to_ptr.vmem [resolvable:$true] %s163_s6 }
  0x29   :  { %v77_v4 = vsub.f32 0.0, %v75_v2  ;;  %v78_v5 = vsub.f32 0.0, %v76_v3  ;;  %s238_s7 = scalar_lea.vmem %s164_s6, 128  ;;  %p243_p3 = scmp.lt.s32.totalorder %s164_s6, %s164_s6 }
  0x2a   :  { %v73_v26 = vsub.f32 %v69_v17, %v71_v18  ;;  %v74_v29 = vsub.f32 %v70_v21, %v72_v22  ;;  %p239_p2 = scmp.ne.s32.totalorder %s164_s6, %s238_s7  ;;  %p244_p4 = scmp.lt.s32.totalorder %s238_s7, %s238_s7 }
  0x2b   :  { %v79_v6 = vmul.f32 1.442695, %v77_v4  ;;  %v81_v7 = vmul.f32 1.442695, %v78_v5 }
  0x2c   :  { %p245_p5 = por %p244_p4, %p243_p3 }
  0x2d   :  { %182 = vpow2.f32 %v79_v6 }
  0x2e   :  { %184 = vpow2.f32 %v81_v7  ;;  %p246_p6 = pnand %p245_p5, %p239_p2 }
  0x37   :  { %v183_v8 = vpop.eup %182 }
  0x38   :  { %v185_v9 = vpop.eup %184  ;;  %v83_v10 = vadd.f32 1.0, %v183_v8  ;;  %v86_v12 = vmul.f32 -0.5, %v183_v8  ;;  %v89_v19 = vand.u32 2147483647, %v183_v8 }
  0x39   :  { %v92_v11 = vadd.f32 1.0, %v185_v9  ;;  %v95_v13 = vmul.f32 -0.5, %v185_v9  ;;  %v98_v23 = vand.u32 2147483647, %v185_v9 }
  0x3a   :  { %186 = vlog2.f32 %v83_v10  ;;  %v87_v16 = vadd.f32 1.0, %v86_v12  ;;  %vm90_vm0 = vcmp.lt.f32.partialorder %v89_v19, 0.0004427343 }
  0x3b   :  { %188 = vlog2.f32 %v92_v11  ;;  %v96_v20 = vadd.f32 1.0, %v95_v13  ;;  %vm99_vm1 = vcmp.lt.f32.partialorder %v98_v23, 0.0004427343 }
  0x3c   :  { %v88_v24 = vmul.f32 %v183_v8, %v87_v16 }
  0x3d   :  { %v97_v27 = vmul.f32 %v185_v9, %v96_v20 }
  0x44   :  { %v187_v25 = vpop.eup %186 }
  0x45   :  { %v189_v28 = vpop.eup %188  ;;  %v85_v30 = vmul.f32 0.6931472, %v187_v25 }
  0x46   :  { %v94_v31 = vmul.f32 0.6931472, %v189_v28 }
  0x47   :  { %v91_v32 = vsel %vm90_vm0, %v88_v24, %v85_v30 }
  0x48   :  { %v100_v33 = vsel %vm99_vm1, %v97_v27, %v94_v31  ;;  %v101_v34 = vadd.f32 %v91_v32, %v73_v26 }
  0x49   :  { %v102_v35 = vadd.f32 %v100_v33, %v74_v29 }
  0x4a   :  { %v103_v36 = vsub.f32 0.0, %v101_v34 }
  0x4b   :  { %v104_v37 = vsub.f32 0.0, %v102_v35 }
  0x4c   :  { %v105_v38 = vmul.f32 1.442695, %v103_v36 }
  0x4d   :  { %v107_v39 = vmul.f32 1.442695, %v104_v37 }
  0x4e   :  { %190 = vpow2.f32 %v105_v38 }
  0x4f   :  { %192 = vpow2.f32 %v107_v39 }
  0x58   :  { %v191_v40 = vpop.eup %190 }
  0x59   :  { %v193_v41 = vpop.eup %192  ;;  %v109_v42 = vsub.f32 1.0, %v191_v40 }
  0x5a   :  { %v110_v43 = vsub.f32 1.0, %v193_v41 }
  0x5b   :  { %v111_v44 = vmul.f32 %v109_v42, %v109_v42 }
  0x5c   :  { %v112_v45 = vmul.f32 %v110_v43, %v110_v43 }
  0x5d   :  { %v113_v46 = vmul.f32 0.25, %v111_v44 }
  0x5e   :  { %v114_v47 = vmul.f32 0.25, %v112_v45 }
  0x5f   :  { %v115_v48 = vmul.f32 %v113_v46, %v101_v34 }
  0x60   :  { %v116_v49 = vmul.f32 %v114_v47, %v102_v35 }
  0x62   :  { %v125_v50 = vadd.f32 %v116_v49, %v115_v48 }
  0x64   :  { %156 = vst [vmem:[#allocation8] sm:$0xff] %v125_v50 }
  0x65   :  { %249 = shalt.err (!%p246_p6)
}
  0x66   :  { %s250_s10 = scalar_lea.hbm %s324_s2, 128 }
  0x67   :  { %p251_p7 = scmp.ne.s32.totalorder %s324_s2, %s250_s10  ;;  %p254_p8 = scmp.lt.u32.totalorder %s250_s10, %s324_s2 }
  0x69   :  { %p256_p9 = pnand %p254_p8, %p251_p7 }
  0x6b   :  { %259 = shalt.err (!%p256_p9)
}
  0x6c   :  { %166 = dma.vmem_to_hbm [thread:$0]  %s164_s6, 128, %s324_s2, [#allocation5]  }
  0x6d   :  { %264 = dma.done.wait [#allocation5], 128  }
  0x6e   :  { %265 = vsyncadd [#allocation5], 4294967168 }
  0x6f   :  { %170 = vsyncpa [#allocation4], 1 }
  0x70   :  { %171 = vsyncpa [#allocation7], 1 }
  0x71   :  { %172 = vsyncpa [#allocation5], 1 }

</bundles_post_ra>
